<compile_context>
chip_gen: v7x
topology: tpu7x:2x2x1
jax: 0.10.0
libtpu: 0.0.40
codegen_flags: <defaults>
</compile_context>

<pallas_src>
import math
import functools

import jax
import jax.numpy as jnp
import numpy as np
from jax import lax
from jax.experimental import pallas as pl
from jax.experimental.pallas import tpu as pltpu


def _attention_layer_kernel(q_ref, k_ref, v_ref, m_ref,
                            wq_ref, bq_ref, wk_ref, bk_ref,
                            wv_ref, bv_ref, wo_ref, bo_ref,
                            o_ref, *, n_heads, d_keys, d_values):
    # q_ref: (TL, D), k_ref/v_ref: (S, Dk), m_ref: (1, S) additive key mask,
    # wo_ref: (H, Dv, D) per-head slices of the output projection.
    TL = q_ref.shape[0]
    S = k_ref.shape[0]
    H, E, Dv = n_heads, d_keys, d_values

    q = q_ref[...]
    k = k_ref[...]
    v = v_ref[...]
    in_dt = q.dtype

    # ---- projections: wide 2D MXU matmuls, native-dtype operands, f32 accum.
    Q = jnp.dot(q, wq_ref[...], preferred_element_type=jnp.float32)
    Q = Q + bq_ref[...].astype(jnp.float32)
    K = jnp.dot(k, wk_ref[...], preferred_element_type=jnp.float32)
    K = K + bk_ref[...].astype(jnp.float32)
    V = jnp.dot(v, wv_ref[...], preferred_element_type=jnp.float32)
    V = V + bv_ref[...].astype(jnp.float32)

    # Fold the 1/sqrt(d_keys) softmax scale into Q once (L*HE muls, not H*L*S).
    Q = Q * (1.0 / math.sqrt(E))

    # ---- head-major layout (leading batch dim for batched MXU dots).
    Qh = jnp.transpose(Q.reshape(TL, H, E), (1, 0, 2)).astype(in_dt)    # (H, TL, E)
    Kh = jnp.transpose(K.reshape(S, H, E), (1, 0, 2)).astype(in_dt)     # (H, S, E)
    Vh = jnp.transpose(V.reshape(S, H, Dv), (1, 0, 2)).astype(in_dt)    # (H, S, Dv)

    # ---- scores: single batched NT matmul (no materialized K transpose).
    s = lax.dot_general(
        Qh, Kh,
        dimension_numbers=(((2,), (2,)), ((0,), (0,))),
        preferred_element_type=jnp.float32)                             # (H, TL, S)
    s = s + m_ref[...].astype(jnp.float32)                              # (1, S) broadcast

    # ---- numerically stable softmax over keys; keep p unnormalized and
    #      rescale after PV with an (approx) EUP reciprocal.
    s_max = jnp.max(s, axis=-1, keepdims=True)
    p = jnp.exp(s - s_max)
    denom = jnp.sum(p, axis=-1, keepdims=True)                          # (H, TL, 1)

    ctx = lax.dot_general(
        p.astype(in_dt), Vh,
        dimension_numbers=(((2,), (1,)), ((0,), (0,))),
        preferred_element_type=jnp.float32)                             # (H, TL, Dv)
    ctx = ctx * pl.reciprocal(denom, approx=True)

    # ---- output projection accumulated over heads: no concat, one batched dot
    #      (H, TL, Dv) x (H, Dv, D) -> (H, TL, D), then a cheap sum over heads.
    out_h = lax.dot_general(
        ctx.astype(wo_ref.dtype), wo_ref[...],
        dimension_numbers=(((2,), (1,)), ((0,), (0,))),
        preferred_element_type=jnp.float32)                             # (H, TL, D)
    out = jnp.sum(out_h, axis=0) + bo_ref[...].astype(jnp.float32)      # (TL, D)
    o_ref[...] = out.astype(o_ref.dtype)


def relative_attention_layer_gen(queries, keys, values, key_add_mask, params,
                                 n_heads, rotary=None, block_l=128):
    """Pallas forward.

    key_add_mask: (N, S) additive float mask combining attn_mask (FullMask in
    the generation path) and key_lengths: 0 where attendable, -1e9 where masked.
    It is broadcast over all L queries inside the kernel, so only (N, S) floats
    are DMA'd instead of (N, L, S).
    """
    # TODO(synk): per-query (N, L, S) attn masks (e.g. causal) would need an
    # extra mask path; the module's generation usage only masks keys.
    del rotary  # unused by the reference forward
    N, L, D = queries.shape
    _, S, Dk = keys.shape
    _, _, Dv_in = values.shape
    wq, bq, wk, bk, wv, bv, wo, bo = params
    HE = wq.shape[1]
    HV = wv.shape[1]
    d_keys = HE // n_heads
    d_values = HV // n_heads

    # Query-dim tiling: bounds the (TL, S) score tensor in VMEM and gives the
    # grid more parallel points. Fall back to TL = L when L is not tileable.
    TL = block_l if (L % block_l == 0) else L
    nL = L // TL

    add_mask3 = key_add_mask.reshape(N, 1, S)              # (N, 1, S)
    wo3 = wo.reshape(n_heads, d_values, D)                 # (H, Dv, D) per-head slices

    kernel = functools.partial(_attention_layer_kernel,
                               n_heads=n_heads, d_keys=d_keys, d_values=d_values)

    in_specs = [
        pl.BlockSpec((None, TL, D),     lambda n, l: (n, l, 0)),   # queries
        pl.BlockSpec((None, S, Dk),     lambda n, l: (n, 0, 0)),   # keys (resident over l)
        pl.BlockSpec((None, S, Dv_in),  lambda n, l: (n, 0, 0)),   # values (resident over l)
        pl.BlockSpec((None, 1, S),      lambda n, l: (n, 0, 0)),   # additive key mask
        pl.BlockSpec((D, HE),   lambda n, l: (0, 0)),              # Wq
        pl.BlockSpec((1, HE),   lambda n, l: (0, 0)),              # bq
        pl.BlockSpec((Dk, HE),  lambda n, l: (0, 0)),              # Wk
        pl.BlockSpec((1, HE),   lambda n, l: (0, 0)),              # bk
        pl.BlockSpec((Dk, HV),  lambda n, l: (0, 0)),              # Wv
        pl.BlockSpec((1, HV),   lambda n, l: (0, 0)),              # bv
        pl.BlockSpec((n_heads, d_values, D), lambda n, l: (0, 0, 0)),  # Wo (H,Dv,D)
        pl.BlockSpec((1, D),    lambda n, l: (0, 0)),              # bo
    ]
    out_specs = pl.BlockSpec((None, TL, D), lambda n, l: (n, l, 0))

    return pl.pallas_call(
        kernel,
        out_shape=jax.ShapeDtypeStruct((N, L, D), queries.dtype),
        grid=(N, nL),
        in_specs=in_specs,
        out_specs=out_specs,
        compiler_params=pltpu.CompilerParams(
            dimension_semantics=("parallel", "parallel")),
    )(queries, keys, values, add_mask3, wq, bq, wk, bk, wv, bv, wo3, bo)


def _reference_forward(queries, keys, values, key_add_mask, params, n_heads):
    """Pure-JAX reference mirroring the PyTorch module semantics."""
    wq, bq, wk, bk, wv, bv, wo, bo = params
    N, L, D = queries.shape
    _, S, _ = keys.shape
    H = n_heads
    E = wq.shape[1] // H
    Dv = wv.shape[1] // H

    Q = (queries @ wq + bq[0]).reshape(N, L, H, E)
    K = (keys @ wk + bk[0]).reshape(N, S, H, E)
    V = (values @ wv + bv[0]).reshape(N, S, H, Dv)

    s = jnp.einsum("nlhe,nshe->nhls", Q, K) / math.sqrt(E)
    s = s + key_add_mask[:, None, None, :]
    p = jax.nn.softmax(s, axis=-1)
    ctx = jnp.einsum("nhls,nshd->nlhd", p, V).reshape(N, L, H * Dv)
    return ctx @ wo + bo[0]


def _init_params(key, d_model, d_model_keys, n_heads, d_keys, d_values):
    """Deterministic torch-Linear-like init: U(-1/sqrt(in), 1/sqrt(in))."""
    ks = jax.random.split(key, 8)

    def lin(kw, kb, fan_in, fan_out):
        bound = 1.0 / math.sqrt(fan_in)
        w = jax.random.uniform(kw, (fan_in, fan_out), jnp.float32, -bound, bound)
        b = jax.random.uniform(kb, (1, fan_out), jnp.float32, -bound, bound)
        return w, b

    wq, bq = lin(ks[0], ks[1], d_model,            d_keys * n_heads)
    wk, bk = lin(ks[2], ks[3], d_model_keys,       d_keys * n_heads)
    wv, bv = lin(ks[4], ks[5], d_model_keys,       d_values * n_heads)
    wo, bo = lin(ks[6], ks[7], d_values * n_heads, d_model)
    return (wq, bq, wk, bk, wv, bv, wo, bo)


if __name__ == "__main__":
    # Small shapes consistent with the module: N batch, L query len, S key len,
    # D = d_model, H heads, d_keys = d_values = D // H.
    N, L, S, D, H = 2, 8, 8, 32, 4
    E = D // H

    key = jax.random.PRNGKey(0)
    k_in, k_par = jax.random.split(key)
    kq, kk, kv = jax.random.split(k_in, 3)

    queries = jax.random.normal(kq, (N, L, D), jnp.float32)
    keys = jax.random.normal(kk, (N, S, D), jnp.float32)
    values = jax.random.normal(kv, (N, S, D), jnp.float32)

    # attn_mask: FullMask (all attendable); key_lengths: per-sequence key counts.
    key_lengths = jnp.array([S, S - 3], dtype=jnp.int32)
    key_valid = jnp.arange(S)[None, :] < key_lengths[:, None]            # (N, S)
    key_add_mask = jnp.where(key_valid, 0.0, -1e9).astype(jnp.float32)   # (N, S)

    params = _init_params(k_par, d_model=D, d_model_keys=D,
                          n_heads=H, d_keys=E, d_values=E)

    out = relative_attention_layer_gen(queries, keys, values, key_add_mask,
                                       params, n_heads=H, rotary=None)
    out = jax.block_until_ready(out)

    ref = _reference_forward(queries, keys, values, key_add_mask, params, n_heads=H)
    np.testing.assert_allclose(np.asarray(out), np.asarray(ref),
                               rtol=2e-2, atol=2e-2)

    print("KERNEL_OK")
</pallas_src>

<mosaic_0001>
module attributes {stable_mosaic.version = 11 : i64} {
  func.func @_attention_layer_kernel(%arg0: i32, %arg1: i32, %arg2: memref<1x8x32xf32, #tpu.memory_space<vmem>>, %arg3: memref<1x8x32xf32, #tpu.memory_space<vmem>>, %arg4: memref<1x8x32xf32, #tpu.memory_space<vmem>>, %arg5: memref<1x1x8xf32, #tpu.memory_space<vmem>>, %arg6: memref<32x32xf32, #tpu.memory_space<vmem>>, %arg7: memref<1x32xf32, #tpu.memory_space<vmem>>, %arg8: memref<32x32xf32, #tpu.memory_space<vmem>>, %arg9: memref<1x32xf32, #tpu.memory_space<vmem>>, %arg10: memref<32x32xf32, #tpu.memory_space<vmem>>, %arg11: memref<1x32xf32, #tpu.memory_space<vmem>>, %arg12: memref<4x8x32xf32, #tpu.memory_space<vmem>>, %arg13: memref<1x32xf32, #tpu.memory_space<vmem>>, %arg14: memref<1x8x32xf32, #tpu.memory_space<vmem>>) attributes {dimension_semantics = [#tpu.dimension_semantics<parallel>, #tpu.dimension_semantics<parallel>], iteration_bounds = array<i64: 2, 1>, scalar_prefetch = 0 : i64, scratch_operands = 0 : i64, tpu.core_type = #tpu.core_type<tc>, window_params = [{transform_indices = @transform_0, window_bounds = array<i64: 1, 8, 32>}, {transform_indices = @transform_1, window_bounds = array<i64: 1, 8, 32>}, {transform_indices = @transform_2, window_bounds = array<i64: 1, 8, 32>}, {transform_indices = @transform_3, window_bounds = array<i64: 1, 1, 8>}, {pipeline_mode = #tpu.pipeline_mode<synchronous>, transform_indices = @transform_4, window_bounds = array<i64: 32, 32>}, {pipeline_mode = #tpu.pipeline_mode<synchronous>, transform_indices = @transform_5, window_bounds = array<i64: 1, 32>}, {pipeline_mode = #tpu.pipeline_mode<synchronous>, transform_indices = @transform_6, window_bounds = array<i64: 32, 32>}, {pipeline_mode = #tpu.pipeline_mode<synchronous>, transform_indices = @transform_7, window_bounds = array<i64: 1, 32>}, {pipeline_mode = #tpu.pipeline_mode<synchronous>, transform_indices = @transform_8, window_bounds = array<i64: 32, 32>}, {pipeline_mode = #tpu.pipeline_mode<synchronous>, transform_indices = @transform_9, window_bounds = array<i64: 1, 32>}, {pipeline_mode = #tpu.pipeline_mode<synchronous>, transform_indices = @transform_10, window_bounds = array<i64: 4, 8, 32>}, {pipeline_mode = #tpu.pipeline_mode<synchronous>, transform_indices = @transform_11, window_bounds = array<i64: 1, 32>}, {transform_indices = @transform_12, window_bounds = array<i64: 1, 8, 32>}]} {
    %c0 = arith.constant 0 : index
    %c0_0 = arith.constant 0 : index
    %c0_1 = arith.constant 0 : index
    %0 = vector.load %arg2[%c0, %c0_0, %c0_1] : memref<1x8x32xf32, #tpu.memory_space<vmem>>, vector<1x8x32xf32>
    %1 = vector.shape_cast %0 : vector<1x8x32xf32> to vector<8x32xf32>
    %c0_2 = arith.constant 0 : index
    %c0_3 = arith.constant 0 : index
    %c0_4 = arith.constant 0 : index
    %2 = vector.load %arg3[%c0_2, %c0_3, %c0_4] : memref<1x8x32xf32, #tpu.memory_space<vmem>>, vector<1x8x32xf32>
    %3 = vector.shape_cast %2 : vector<1x8x32xf32> to vector<8x32xf32>
    %c0_5 = arith.constant 0 : index
    %c0_6 = arith.constant 0 : index
    %c0_7 = arith.constant 0 : index
    %4 = vector.load %arg4[%c0_5, %c0_6, %c0_7] : memref<1x8x32xf32, #tpu.memory_space<vmem>>, vector<1x8x32xf32>
    %5 = vector.shape_cast %4 : vector<1x8x32xf32> to vector<8x32xf32>
    %c0_8 = arith.constant 0 : index
    %c0_9 = arith.constant 0 : index
    %6 = vector.load %arg6[%c0_8, %c0_9] : memref<32x32xf32, #tpu.memory_space<vmem>>, vector<32x32xf32>
    %cst = arith.constant dense<0.000000e+00> : vector<8x32xf32>
    %7 = tpu.matmul %1, %6, %cst {dimension_numbers = #tpu.dot_dimension_numbers<[1], [0], [0], [1], [0, 0, 1, 1], [], []>} : vector<8x32xf32>, vector<32x32xf32>, vector<8x32xf32> -> vector<8x32xf32>
    %c0_10 = arith.constant 0 : index
    %c0_11 = arith.constant 0 : index
    %8 = vector.load %arg7[%c0_10, %c0_11] : memref<1x32xf32, #tpu.memory_space<vmem>>, vector<1x32xf32>
    %9 = vector.broadcast %8 : vector<1x32xf32> to vector<8x32xf32>
    %10 = arith.addf %7, %9 : vector<8x32xf32>
    %c0_12 = arith.constant 0 : index
    %c0_13 = arith.constant 0 : index
    %11 = vector.load %arg8[%c0_12, %c0_13] : memref<32x32xf32, #tpu.memory_space<vmem>>, vector<32x32xf32>
    %cst_14 = arith.constant dense<0.000000e+00> : vector<8x32xf32>
    %12 = tpu.matmul %3, %11, %cst_14 {dimension_numbers = #tpu.dot_dimension_numbers<[1], [0], [0], [1], [0, 0, 1, 1], [], []>} : vector<8x32xf32>, vector<32x32xf32>, vector<8x32xf32> -> vector<8x32xf32>
    %c0_15 = arith.constant 0 : index
    %c0_16 = arith.constant 0 : index
    %13 = vector.load %arg9[%c0_15, %c0_16] : memref<1x32xf32, #tpu.memory_space<vmem>>, vector<1x32xf32>
    %14 = vector.broadcast %13 : vector<1x32xf32> to vector<8x32xf32>
    %15 = arith.addf %12, %14 : vector<8x32xf32>
    %c0_17 = arith.constant 0 : index
    %c0_18 = arith.constant 0 : index
    %16 = vector.load %arg10[%c0_17, %c0_18] : memref<32x32xf32, #tpu.memory_space<vmem>>, vector<32x32xf32>
    %cst_19 = arith.constant dense<0.000000e+00> : vector<8x32xf32>
    %17 = tpu.matmul %5, %16, %cst_19 {dimension_numbers = #tpu.dot_dimension_numbers<[1], [0], [0], [1], [0, 0, 1, 1], [], []>} : vector<8x32xf32>, vector<32x32xf32>, vector<8x32xf32> -> vector<8x32xf32>
    %c0_20 = arith.constant 0 : index
    %c0_21 = arith.constant 0 : index
    %18 = vector.load %arg11[%c0_20, %c0_21] : memref<1x32xf32, #tpu.memory_space<vmem>>, vector<1x32xf32>
    %19 = vector.broadcast %18 : vector<1x32xf32> to vector<8x32xf32>
    %20 = arith.addf %17, %19 : vector<8x32xf32>
    %cst_22 = arith.constant 0.353553385 : f32
    %21 = vector.broadcast %cst_22 : f32 to vector<8x32xf32>
    %22 = arith.mulf %10, %21 : vector<8x32xf32>
    %23 = vector.shape_cast %22 : vector<8x32xf32> to vector<8x4x8xf32>
    %24 = tpu.transpose %23, [1, 0, 2] : vector<8x4x8xf32> -> vector<4x8x8xf32>
    %25 = vector.shape_cast %15 : vector<8x32xf32> to vector<8x4x8xf32>
    %26 = tpu.transpose %25, [1, 0, 2] : vector<8x4x8xf32> -> vector<4x8x8xf32>
    %27 = vector.shape_cast %20 : vector<8x32xf32> to vector<8x4x8xf32>
    %28 = tpu.transpose %27, [1, 0, 2] : vector<8x4x8xf32> -> vector<4x8x8xf32>
    %cst_23 = arith.constant dense<0.000000e+00> : vector<4x8x8xf32>
    %29 = tpu.matmul %24, %26, %cst_23 {dimension_numbers = #tpu.dot_dimension_numbers<[2], [2], [1], [1], [0, 0, 0, 1, 1, 1], [0], [0]>} : vector<4x8x8xf32>, vector<4x8x8xf32>, vector<4x8x8xf32> -> vector<4x8x8xf32>
    %c0_24 = arith.constant 0 : index
    %c0_25 = arith.constant 0 : index
    %c0_26 = arith.constant 0 : index
    %30 = vector.load %arg5[%c0_24, %c0_25, %c0_26] : memref<1x1x8xf32, #tpu.memory_space<vmem>>, vector<1x1x8xf32>
    %31 = vector.shape_cast %30 : vector<1x1x8xf32> to vector<1x8xf32>
    %32 = vector.shape_cast %31 : vector<1x8xf32> to vector<1x1x8xf32>
    %33 = vector.broadcast %32 : vector<1x1x8xf32> to vector<4x8x8xf32>
    %34 = arith.addf %29, %33 : vector<4x8x8xf32>
    %cst_27 = arith.constant dense<0xFF800000> : vector<4x8xf32>
    %35 = vector.multi_reduction <maximumf>, %34, %cst_27 [2] : vector<4x8x8xf32> to vector<4x8xf32>
    %36 = vector.shape_cast %35 : vector<4x8xf32> to vector<4x8x1xf32>
    %37 = vector.broadcast %36 : vector<4x8x1xf32> to vector<4x8x8xf32>
    %38 = arith.subf %34, %37 : vector<4x8x8xf32>
    %39 = math.exp %38 : vector<4x8x8xf32>
    %cst_28 = arith.constant dense<0.000000e+00> : vector<4x8xf32>
    %40 = vector.multi_reduction <add>, %39, %cst_28 [2] : vector<4x8x8xf32> to vector<4x8xf32>
    %41 = vector.shape_cast %40 : vector<4x8xf32> to vector<4x8x1xf32>
    %cst_29 = arith.constant dense<0.000000e+00> : vector<4x8x8xf32>
    %42 = tpu.matmul %39, %28, %cst_29 {dimension_numbers = #tpu.dot_dimension_numbers<[2], [1], [1], [2], [0, 0, 0, 1, 1, 2], [0], [0]>} : vector<4x8x8xf32>, vector<4x8x8xf32>, vector<4x8x8xf32> -> vector<4x8x8xf32>
    %43 = tpu.reciprocal %41 {approx = true} : vector<4x8x1xf32> -> vector<4x8x1xf32>
    %44 = vector.broadcast %43 : vector<4x8x1xf32> to vector<4x8x8xf32>
    %45 = arith.mulf %42, %44 : vector<4x8x8xf32>
    %c0_30 = arith.constant 0 : index
    %c0_31 = arith.constant 0 : index
    %c0_32 = arith.constant 0 : index
    %46 = vector.load %arg12[%c0_30, %c0_31, %c0_32] : memref<4x8x32xf32, #tpu.memory_space<vmem>>, vector<4x8x32xf32>
    %cst_33 = arith.constant dense<0.000000e+00> : vector<4x8x32xf32>
    %47 = tpu.matmul %45, %46, %cst_33 {dimension_numbers = #tpu.dot_dimension_numbers<[2], [1], [1], [2], [0, 0, 0, 1, 1, 2], [0], [0]>} : vector<4x8x8xf32>, vector<4x8x32xf32>, vector<4x8x32xf32> -> vector<4x8x32xf32>
    %cst_34 = arith.constant dense<0.000000e+00> : vector<8x32xf32>
    %48 = vector.multi_reduction <add>, %47, %cst_34 [0] : vector<4x8x32xf32> to vector<8x32xf32>
    %c0_35 = arith.constant 0 : index
    %c0_36 = arith.constant 0 : index
    %49 = vector.load %arg13[%c0_35, %c0_36] : memref<1x32xf32, #tpu.memory_space<vmem>>, vector<1x32xf32>
    %50 = vector.broadcast %49 : vector<1x32xf32> to vector<8x32xf32>
    %51 = arith.addf %48, %50 : vector<8x32xf32>
    %c0_37 = arith.constant 0 : index
    %c0_38 = arith.constant 0 : index
    %c0_39 = arith.constant 0 : index
    %52 = vector.load %arg14[%c0_37, %c0_38, %c0_39] : memref<1x8x32xf32, #tpu.memory_space<vmem>>, vector<1x8x32xf32>
    %53 = vector.shape_cast %52 : vector<1x8x32xf32> to vector<8x32xf32>
    %54 = vector.shape_cast %51 : vector<8x32xf32> to vector<1x8x32xf32>
    tpu.vector_store %arg14[%c0_37, %c0_38, %c0_39], %54 {strides = array<i32>} : memref<1x8x32xf32, #tpu.memory_space<vmem>>, vector<1x8x32xf32>,
    return
  }
  func.func @transform_0(%arg0: i32, %arg1: i32) -> (i32, i32, i32) {
    %c0_i32 = arith.constant 0 : i32
    %c0_i32_0 = arith.constant 0 : i32
    return %arg0, %arg1, %c0_i32 : i32, i32, i32
  }
  func.func @transform_1(%arg0: i32, %arg1: i32) -> (i32, i32, i32) {
    %c0_i32 = arith.constant 0 : i32
    %c0_i32_0 = arith.constant 0 : i32
    %c0_i32_1 = arith.constant 0 : i32
    return %arg0, %c0_i32, %c0_i32_0 : i32, i32, i32
  }
  func.func @transform_2(%arg0: i32, %arg1: i32) -> (i32, i32, i32) {
    %c0_i32 = arith.constant 0 : i32
    %c0_i32_0 = arith.constant 0 : i32
    %c0_i32_1 = arith.constant 0 : i32
    return %arg0, %c0_i32, %c0_i32_0 : i32, i32, i32
  }
  func.func @transform_3(%arg0: i32, %arg1: i32) -> (i32, i32, i32) {
    %c0_i32 = arith.constant 0 : i32
    %c0_i32_0 = arith.constant 0 : i32
    %c0_i32_1 = arith.constant 0 : i32
    return %arg0, %c0_i32, %c0_i32_0 : i32, i32, i32
  }
  func.func @transform_4(%arg0: i32, %arg1: i32) -> (i32, i32) {
    %c0_i32 = arith.constant 0 : i32
    %c0_i32_0 = arith.constant 0 : i32
    %c0_i32_1 = arith.constant 0 : i32
    return %c0_i32, %c0_i32_0 : i32, i32
  }
  func.func @transform_5(%arg0: i32, %arg1: i32) -> (i32, i32) {
    %c0_i32 = arith.constant 0 : i32
    %c0_i32_0 = arith.constant 0 : i32
    %c0_i32_1 = arith.constant 0 : i32
    return %c0_i32, %c0_i32_0 : i32, i32
  }
  func.func @transform_6(%arg0: i32, %arg1: i32) -> (i32, i32) {
    %c0_i32 = arith.constant 0 : i32
    %c0_i32_0 = arith.constant 0 : i32
    %c0_i32_1 = arith.constant 0 : i32
    return %c0_i32, %c0_i32_0 : i32, i32
  }
  func.func @transform_7(%arg0: i32, %arg1: i32) -> (i32, i32) {
    %c0_i32 = arith.constant 0 : i32
    %c0_i32_0 = arith.constant 0 : i32
    %c0_i32_1 = arith.constant 0 : i32
    return %c0_i32, %c0_i32_0 : i32, i32
  }
  func.func @transform_8(%arg0: i32, %arg1: i32) -> (i32, i32) {
    %c0_i32 = arith.constant 0 : i32
    %c0_i32_0 = arith.constant 0 : i32
    %c0_i32_1 = arith.constant 0 : i32
    return %c0_i32, %c0_i32_0 : i32, i32
  }
  func.func @transform_9(%arg0: i32, %arg1: i32) -> (i32, i32) {
    %c0_i32 = arith.constant 0 : i32
    %c0_i32_0 = arith.constant 0 : i32
    %c0_i32_1 = arith.constant 0 : i32
    return %c0_i32, %c0_i32_0 : i32, i32
  }
  func.func @transform_10(%arg0: i32, %arg1: i32) -> (i32, i32, i32) {
    %c0_i32 = arith.constant 0 : i32
    %c0_i32_0 = arith.constant 0 : i32
    %c0_i32_1 = arith.constant 0 : i32
    %c0_i32_2 = arith.constant 0 : i32
    return %c0_i32, %c0_i32_0, %c0_i32_1 : i32, i32, i32
  }
  func.func @transform_11(%arg0: i32, %arg1: i32) -> (i32, i32) {
    %c0_i32 = arith.constant 0 : i32
    %c0_i32_0 = arith.constant 0 : i32
    %c0_i32_1 = arith.constant 0 : i32
    return %c0_i32, %c0_i32_0 : i32, i32
  }
  func.func @transform_12(%arg0: i32, %arg1: i32) -> (i32, i32, i32) {
    %c0_i32 = arith.constant 0 : i32
    %c0_i32_0 = arith.constant 0 : i32
    return %arg0, %arg1, %c0_i32 : i32, i32, i32
  }
}

</mosaic_0001>

<bundles_post_ra>
// kernel: tpu_custom_call.1
= control target key start
LH: loop header
LB: loop body
LE: loop exit
PB: predicated region body
PF: predicated region fallthrough
CT: control target
= control target key end

     0   :  { %s3606_s0 = inlined_call_operand.hbm [shape: f32[2,8,32], index: 0, kind: input, shape index: {}]   ;;  %s3607_s1 = inlined_call_operand.hbm [shape: f32[2,8,32], index: 1, kind: input, shape index: {}]   ;;  %s3608_s2 = inlined_call_operand.hbm [shape: f32[2,8,32], index: 2, kind: input, shape index: {}]   ;;  %s3609_s3 = inlined_call_operand.vmem [shape: f32[2,1,8], index: 3, kind: input, shape index: {}]   ;;  %s3610_s4 = inlined_call_operand.hbm [shape: f32[32,32], index: 4, kind: input, shape index: {}]   ;;  %s3611_s5 = inlined_call_operand.vmem [shape: f32[1,32], index: 5, kind: input, shape index: {}]   ;;  %s3612_s6 = inlined_call_operand.hbm [shape: f32[32,32], index: 6, kind: input, shape index: {}]   ;;  %s3613_s7 = inlined_call_operand.vmem [shape: f32[1,32], index: 7, kind: input, shape index: {}]   ;;  %s3614_s8 = inlined_call_operand.hbm [shape: f32[32,32], index: 8, kind: input, shape index: {}]   ;;  %s3615_s9 = inlined_call_operand.vmem [shape: f32[1,32], index: 9, kind: input, shape index: {}]   ;;  %s3616_s10 = inlined_call_operand.vmem [shape: f32[4,8,32], index: 10, kind: input, shape index: {}]   ;;  %s3617_s11 = inlined_call_operand.vmem [shape: f32[1,32], index: 11, kind: input, shape index: {}]   ;;  %s3618_s12 = inlined_call_operand.hbm [shape: f32[2,8,32], index: 12, kind: output, shape index: {}]  }
   0x1   :  { %3647 = sst [smem:[#allocation27_spill]] %s3607_s1 }
   0x2   :  { %3648 = sst [smem:[#allocation28_spill]] %s3609_s3 }
   0x3   :  { %3649 = sst [smem:[#allocation29_spill]] %s3610_s4 }
   0x4   :  { %3650 = sst [smem:[#allocation30_spill]] %s3611_s5 }
   0x5   :  { %3651 = sst [smem:[#allocation31_spill]] %s3615_s9 }
   0x6   :  { %3652 = sst [smem:[#allocation32_spill]] %s3616_s10 }
   0x7   :  { %3653 = sst [smem:[#allocation33_spill]] %s3617_s11 }
   0x8   :  { %3654 = sst [smem:[#allocation34_spill]] %s3618_s12 }
   0x9   :  { %17 = vsyncpa [#allocation3], 0 }
   0xa   :  { %19 = vsyncpa [#allocation3 + $0x1], 0 }
   0xb   :  { %20 = vsyncpa [#allocation6], 0 }
   0xc   :  { %22 = vsyncpa [#allocation6 + $0x1], 0 }
   0xd   :  { %23 = vsyncpa [#allocation9], 0 }
   0xe   :  { %24 = vsyncpa [#allocation12], 0 }
   0xf   :  { %25 = vsyncpa [#allocation4], 0 }
  0x10   :  { %27 = vsyncpa [#allocation4 + $0x1], 0  ;;  %s3092_s21 = smov 0   ;;  %s3094_s22 = smov 0  }
  0x11   :  { %s3096_s23 = smov 0   ;;  %s3098_s24 = smov 0  }
  0x12   :  { %s3100_s25 = smov 0   ;;  %s3102_s26 = smov 0  }
  0x13 LB: > { %3655 = sst [smem:[#allocation19_spill]] %s2988_s21  ;;  %s3123_s27 = sadd.s32 4294967295, %s3008_s26   ;;  %s3008_s26 = sphi %s3102_s26, %s33_s26   ;;  %s3004_s25 = sphi %s3100_s25, %s3704_s25   ;;  %s3000_s24 = sphi %s3098_s24, %s3703_s24   ;;  %s2996_s23 = sphi %s3096_s23, %s3707_s23   ;;  %s2992_s22 = sphi %s3094_s22, %s3706_s22   ;;  %s2988_s21 = sphi %s3092_s21, %s3705_s21  }
  0x14   : > { %3656 = sst [smem:[#allocation20_spill]] %s3000_s24  ;;  %s2407_s28 = sadd.s32 4294967294, %s3008_s26  }
  0x15   : > { %3657 = sst [smem:[#allocation21_spill]] %s3004_s25  ;;  %p67_p0 = scmp.ne.s32.totalorder %s2992_s22, %s2988_s21 }
  0x16   : > { %3658 = sst [smem:[#allocation22_spill]] %s3008_s26  ;;  %p3622_p1 = scmp.eq.s32.totalorder %s3123_s27, 0 }
  0x17   : > { %p345_p3 = scmp.eq.s32.totalorder %s2407_s28, 1  ;;  %p2408_p5 = scmp.ge.s32.totalorder %s3008_s26, 1 }
  0x18   : > { %p3132_p4 = por %p3622_p1, %p67_p0  ;;  %p352_p7 = scmp.lt.s32.totalorder %s3008_s26, 3 }
  0x19   : > { %p3137_p6 = por %p345_p3, %p67_p0  ;;  %s3010_s14 = smov [#allocation8]  }
  0x1a   : > { %s3659_s29 = scalar_select %p3132_p4, 1, 0 }
  0x1b   : > { %s3660_s30 = scalar_select %p3137_p6, 1, 0 }
  0x1c   : > { %p3142_p8 = pnand %p2408_p5, %p352_p7  ;;  %s364_s15 = sshll.u32 %s3010_s14, 4  ;;  %s365_s15 = int_to_ptr.vmem [resolvable:$true] %s364_s15 }
  0x1d   : > { %3661 = sst [smem:[#allocation23_spill]] %s3660_s30  ;;  %s45_s17 = sadd.s32 1, %s3004_s25 }
  0x1e   : > { %s3662_s13 = scalar_select %p3142_p8, 1, 0 }
  0x1f   : > { %p2631_p9 = pneg %p3142_p8  ;;  %s3664_s4 = sld [smem:[#allocation29_spill]] }
  0x21   : > { %p3151_p11 = pnand %p2631_p9, %p3622_p1 }
  0x23   : > { %s3663_s16 = scalar_select %p3151_p11, 1, 0 }
  0x24   : > { %p3164_p13 = pneg %p3151_p11 }
  0x25   : > { %s2740_s20 = scalar_lea.hbm %s3664_s4, 512 }
  0x26   : > { %p2741_p12 = scmp.ne.s32.totalorder %s3664_s4, %s2740_s20  ;;  %p2747_p5 = scmp.lt.u32.totalorder %s2740_s20, %s3664_s4 }
  0x27   : > { %s3665_s14 = scalar_select %p3164_p13, 1, 0 }
  0x28   : > { %p2743_p0 = pnand %p3164_p13, %p2741_p12 }
  0x2a   : > { %p2744_p3 = pneg %p2743_p0 }
  0x2c   : > { %p2749_p7 = pnand %p2747_p5, %p2744_p3 }
  0x2e   : > { %2752 = shalt.err (!%p2749_p7)
}
  0x2f   : > { %s2753_s18 = scalar_lea.vmem %s365_s15, 512  ;;  %p2761_p2 = scmp.lt.s32.totalorder %s365_s15, %s365_s15 }
  0x30   : > { %p2754_p9 = scmp.ne.s32.totalorder %s365_s15, %s2753_s18  ;;  %p2762_p6 = scmp.lt.s32.totalorder %s2753_s18, %s2753_s18 }
  0x32   : > { %p2756_p10 = pnand %p2754_p9, %p3164_p13  ;;  %p2763_p4 = por %p2762_p6, %p2761_p2 }
  0x34   : > { %p2757_p1 = pneg %p2756_p10 }
  0x36   : > { %p2764_p8 = pnand %p2763_p4, %p2757_p1 }
  0x38   : > { %2767 = shalt.err (!%p2764_p8)
}
  0x39   : > { %s3625_s30 = smov 128   ;;  %s3627_s12 = smov 8  }
  0x3a   : > { %2634 = dma.hbm_to_vmem [thread:$0]  (!%p3151_p11), %s3664_s4, 512, %s365_s15, [#allocation9], %s3625_s30, %s3625_s30, %s3627_s12  }
  0x3b   : > { %p47_p1 = scmp.ge.s32.totalorder %s45_s17, 2  ;;  %s54_s20 = sadd.s32 1, %s2996_s23 }
  0x3c   : > { %p61_p2 = scmp.ne.s32.totalorder %s2996_s23, %s2992_s22  ;;  %p62_p4 = scmp.eq.s32.totalorder %s3008_s26, 0 }
  0x3d   : > { %s3709_s17 = smov (%p47_p1, %s45_s17), 0  ;;  %p3667_p8 = scmp.eq.s32.totalorder %s3123_s27, 1 }
  0x3e   : > { %3666 = sst [smem:[#allocation24_spill]] %s3709_s17  ;;  %p63_p6 = por %p62_p4, %p61_p2 }
  0x3f   : > { %p3191_p10 = por %p3667_p8, %p61_p2  ;;  %s49_s18 = ssub.s32 %s3004_s25, %s3709_s17 }
  0x40   : > { %p2658_p12 = scmp.lt.s32.totalorder %s3008_s26, 2  ;;  %p52_p0 = scmp.eq.s32.totalorder %s49_s18, 0 }
  0x41   : > { %s3668_s28 = scalar_select %p3191_p10, 1, 0 }
  0x42   : > { %s3630_s11 = sand.u32 1, %s2996_s23   ;;  %s3204_s21 = sshll.u32 %s3004_s25, 7 }
  0x43   : > { %3669 = sst [smem:[#allocation25_spill]] %s3668_s28  ;;  %s3201_s15 = sshll.u32 %s3630_s11, 3 }
  0x44   : > { %s3207_s19 = scalar_select %p52_p0, %s2996_s23, %s54_s20  }
  0x45   : > { %p3209_p3 = pnand %p2658_p12, %p63_p6  ;;  %s438_s12 = sand.u32 1, %s3008_s26  }
  0x46   : > { %3670 = sst [smem:[#allocation26_spill]] %s3207_s19  ;;  %s3672_s1 = sld [smem:[#allocation27_spill]] }
  0x47   : > { %s3671_s30 = scalar_select %p3209_p3, 1, 0 }
  0x48   : > { %s442_s11 = scalar_lea.vmem [#allocation5], %s3201_s15  ;;  %s3013_s20 = smov [#allocation10]  }
  0x49   : > { %s449_s25 = sshll.u32 %s442_s11, 4  ;;  %s3223_s19 = sshll.u32 %s3013_s20, 4  ;;  %s3221_s25 = int_to_ptr.vmem [resolvable:$true] %s449_s25  ;;  %s381_s19 = int_to_ptr.vmem [resolvable:$true] %s3223_s19 }
  0x4a   : > { %s3225_s28 = scalar_lea.sflag [#allocation6], %s438_s12  ;;  %p3231_p7 = pneg %p3209_p3 }
  0x4c   : > { %s3218_s18 = scalar_lea.hbm %s3672_s1, %s3204_s21  ;;  %s2773_s26 = scalar_lea.hbm %s3672_s1, 256 }
  0x4d   : > { %s2768_s10 = scalar_lea.hbm %s3218_s18, 128  ;;  %p2774_p2 = scmp.lt.u32.totalorder %s3218_s18, %s3672_s1 }
  0x4e   : > { %p2769_p5 = scmp.ne.s32.totalorder %s3218_s18, %s2768_s10  ;;  %p2775_p4 = scmp.lt.u32.totalorder %s2773_s26, %s2768_s10 }
  0x4f   : > { %s3673_s4 = scalar_select %p3231_p7, 1, 0 }
  0x50   : > { %p2771_p9 = pnand %p3231_p7, %p2769_p5  ;;  %p2776_p6 = por %p2775_p4, %p2774_p2 }
  0x51   : > { %p2777_p8 = scmp.lt.u32.totalorder %s2768_s10, %s3218_s18 }
  0x52   : > { %p2772_p1 = pneg %p2771_p9 }
  0x53   : > { %p2778_p12 = por %p2777_p8, %p2776_p6 }
  0x55   : > { %p2779_p0 = pnand %p2778_p12, %p2772_p1 }
  0x57   : > { %2782 = shalt.err (!%p2779_p0)
}
  0x58   : > { %s2783_s12 = scalar_lea.vmem %s3221_s25, 128  ;;  %s3014_s17 = smov [#allocation5]  }
  0x59   : > { %p2784_p5 = scmp.ne.s32.totalorder %s3221_s25, %s2783_s12  ;;  %s2788_s11 = sshll.u32 %s3014_s17, 4  ;;  %s2789_s11 = int_to_ptr.vmem [resolvable:$false] %s2788_s11 }
  0x5a   : > { %s2790_s3 = scalar_lea.vmem %s2789_s11, 256  ;;  %p2791_p11 = scmp.lt.s32.totalorder %s3221_s25, %s2789_s11 }
  0x5b   : > { %p2786_p9 = pnand %p2784_p5, %p3231_p7  ;;  %p2792_p13 = scmp.lt.s32.totalorder %s2790_s3, %s2783_s12 }
  0x5d   : > { %p2787_p10 = pneg %p2786_p9  ;;  %p2793_p2 = por %p2792_p13, %p2791_p11 }
  0x5f   : > { %p2794_p4 = pnand %p2793_p2, %p2787_p10 }
  0x61   : > { %2797 = shalt.err (!%p2794_p4)
}
  0x62   : > { %2647 = dma.hbm_to_vmem [thread:$0]  (!%p3209_p3), %s3218_s18, 128, %s3221_s25, %s3225_s28  }
  0x63   : > { %s2798_s20 = scalar_lea.hbm %s3612_s6, 512  ;;  %p3674_p11 = scmp.ne.s32.totalorder %s3665_s14, 0 }
  0x64   : > { %p2799_p1 = scmp.ne.s32.totalorder %s3612_s6, %s2798_s20  ;;  %p2805_p6 = scmp.lt.u32.totalorder %s2798_s20, %s3612_s6 }
  0x66   : > { %p2801_p13 = pnand %p2799_p1, %p3674_p11 }
  0x68   : > { %p2802_p10 = pneg %p2801_p13 }
  0x6a   : > { %p2807_p8 = pnand %p2805_p6, %p2802_p10 }
  0x6c   : > { %2810 = shalt.err (!%p2807_p8)
}
  0x6d   : > { %s2811_s3 = scalar_lea.vmem %s381_s19, 512  ;;  %p2819_p9 = scmp.lt.s32.totalorder %s381_s19, %s381_s19 }
  0x6e   : > { %p2812_p12 = scmp.ne.s32.totalorder %s381_s19, %s2811_s3  ;;  %p2820_p2 = scmp.lt.s32.totalorder %s2811_s3, %s2811_s3 }
  0x70   : > { %p2814_p0 = pnand %p2812_p12, %p3674_p11  ;;  %p2821_p4 = por %p2820_p2, %p2819_p9 }
  0x72   : > { %p2815_p5 = pneg %p2814_p0 }
  0x74   : > { %p2822_p3 = pnand %p2821_p4, %p2815_p5 }
  0x76   : > { %2825 = shalt.err (!%p2822_p3)
}
  0x77   : > { %p3675_p1 = scmp.ne.s32.totalorder %s3663_s16, 0  ;;  %s3676_s1 = smov 8  }
  0x78   : > { %s3677_s25 = smov 128   ;;  %s3015_s26 = smov [#allocation11]  }
  0x79   : > { %2637 = dma.hbm_to_vmem [thread:$0]  (!%p3675_p1), %s3612_s6, 512, %s381_s19, [#allocation9], %s3677_s25, %s3677_s25, %s3676_s1  }
  0x7a   : > { %s396_s20 = sshll.u32 %s3015_s26, 4  ;;  %s2826_s11 = scalar_lea.hbm %s3614_s8, 512  ;;  %s397_s20 = int_to_ptr.vmem [resolvable:$true] %s396_s20 }
  0x7b   : > { %p2827_p3 = scmp.ne.s32.totalorder %s3614_s8, %s2826_s11  ;;  %p2833_p6 = scmp.lt.u32.totalorder %s2826_s11, %s3614_s8 }
  0x7d   : > { %p2829_p13 = pnand %p2827_p3, %p3674_p11 }
  0x7f   : > { %p2830_p10 = pneg %p2829_p13 }
  0x81   : > { %p2835_p8 = pnand %p2833_p6, %p2830_p10 }
  0x83   : > { %2838 = shalt.err (!%p2835_p8)
}
  0x84   : > { %s2839_s19 = scalar_lea.vmem %s397_s20, 512  ;;  %p2847_p9 = scmp.lt.s32.totalorder %s397_s20, %s397_s20 }
  0x85   : > { %p2840_p12 = scmp.ne.s32.totalorder %s397_s20, %s2839_s19  ;;  %p2848_p2 = scmp.lt.s32.totalorder %s2839_s19, %s2839_s19 }
  0x87   : > { %p2842_p0 = pnand %p2840_p12, %p3674_p11  ;;  %p2849_p4 = por %p2848_p2, %p2847_p9 }
  0x89   : > { %p2843_p5 = pneg %p2842_p0 }
  0x8b   : > { %p2850_p7 = pnand %p2849_p4, %p2843_p5 }
  0x8d   : > { %2853 = shalt.err (!%p2850_p7)
}
  0x8e   : > { %2640 = dma.hbm_to_vmem [thread:$0]  (!%p3675_p1), %s3614_s8, 512, %s397_s20, [#allocation12], %s3677_s25, %s3677_s25, %s3676_s1  }
  0x8f   : > { %s3302_s18 = scalar_lea.hbm %s3606_s0, %s3204_s21  ;;  %s423_s16 = scalar_lea.vmem [#allocation2], %s3201_s15 }
  0x90   : > { %s431_s10 = sshll.u32 %s423_s16, 4  ;;  %s3678_s26 = sand.u32 1, %s2996_s23   ;;  %s432_s10 = int_to_ptr.vmem [resolvable:$true] %s431_s10 }
  0x91   : > { %s420_s17 = scalar_lea.sflag [#allocation3], %s3678_s26  ;;  %s2854_s12 = scalar_lea.hbm %s3302_s18, 128 }
  0x92   : > { %p2855_p7 = scmp.ne.s32.totalorder %s3302_s18, %s2854_s12  ;;  %p3679_p11 = scmp.ne.s32.totalorder %s3673_s4, 0 }
  0x93   : > { %s2859_s20 = scalar_lea.hbm %s3606_s0, 256  ;;  %p2860_p1 = scmp.lt.u32.totalorder %s3302_s18, %s3606_s0 }
  0x94   : > { %p2857_p3 = pnand %p2855_p7, %p3679_p11  ;;  %p2861_p10 = scmp.lt.u32.totalorder %s2859_s20, %s2854_s12 }
  0x95   : > { %p2863_p8 = scmp.lt.u32.totalorder %s2854_s12, %s3302_s18 }
  0x96   : > { %p2858_p13 = pneg %p2857_p3  ;;  %p2862_p6 = por %p2861_p10, %p2860_p1 }
  0x98   : > { %p2864_p12 = por %p2863_p8, %p2862_p6 }
  0x9a   : > { %p2865_p0 = pnand %p2864_p12, %p2858_p13 }
  0x9c   : > { %2868 = shalt.err (!%p2865_p0)
}
  0x9d   : > { %s2869_s19 = scalar_lea.vmem %s432_s10, 128  ;;  %s3016_s5 = smov [#allocation2]  }
  0x9e   : > { %p2870_p5 = scmp.ne.s32.totalorder %s432_s10, %s2869_s19  ;;  %s2874_s9 = sshll.u32 %s3016_s5, 4  ;;  %s2875_s9 = int_to_ptr.vmem [resolvable:$false] %s2874_s9 }
  0x9f   : > { %s2876_s24 = scalar_lea.vmem %s2875_s9, 256  ;;  %p2877_p4 = scmp.lt.s32.totalorder %s432_s10, %s2875_s9 }
  0xa0   : > { %p2872_p9 = pnand %p2870_p5, %p3679_p11  ;;  %p2878_p7 = scmp.lt.s32.totalorder %s2876_s24, %s2869_s19 }
  0xa2   : > { %p2873_p2 = pneg %p2872_p9  ;;  %p2879_p3 = por %p2878_p7, %p2877_p4 }
  0xa4   : > { %p2880_p1 = pnand %p2879_p3, %p2873_p2 }
  0xa6   : > { %2883 = shalt.err (!%p2880_p1)
}
  0xa7   : > { %p3680_p10 = scmp.ne.s32.totalorder %s3671_s30, 0  ;;  %s3328_s26 = scalar_lea.hbm %s3608_s2, %s3204_s21 }
  0xa8   : > { %s460_s12 = scalar_lea.vmem [#allocation7], %s3201_s15  ;;  %s2884_s25 = scalar_lea.hbm %s3328_s26, 128 }
  0xa9   : > { %2644 = dma.hbm_to_vmem [thread:$0]  (!%p3680_p10), %s3302_s18, 128, %s432_s10, %s420_s17  }
  0xaa   : > { %s467_s1 = sshll.u32 %s460_s12, 4  ;;  %p2885_p13 = scmp.ne.s32.totalorder %s3328_s26, %s2884_s25  ;;  %s468_s1 = int_to_ptr.vmem [resolvable:$true] %s467_s1 }
  0xab   : > { %s2889_s18 = scalar_lea.hbm %s3608_s2, 256  ;;  %p2890_p12 = scmp.lt.u32.totalorder %s3328_s26, %s3608_s2 }
  0xac   : > { %p2887_p6 = pnand %p2885_p13, %p3679_p11  ;;  %p2891_p0 = scmp.lt.u32.totalorder %s2889_s18, %s2884_s25 }
  0xad   : > { %p2893_p9 = scmp.lt.u32.totalorder %s2884_s25, %s3328_s26 }
  0xae   : > { %p2888_p8 = pneg %p2887_p6  ;;  %p2892_p5 = por %p2891_p0, %p2890_p12 }
  0xb0   : > { %p2894_p2 = por %p2893_p9, %p2892_p5 }
  0xb2   : > { %p2895_p4 = pnand %p2894_p2, %p2888_p8 }
  0xb4   : > { %2898 = shalt.err (!%p2895_p4)
}
  0xb5   : > { %s2899_s15 = scalar_lea.vmem %s468_s1, 128  ;;  %s3017_s21 = smov [#allocation7]  }
  0xb6   : > { %p2900_p7 = scmp.ne.s32.totalorder %s468_s1, %s2899_s15  ;;  %s2904_s3 = sshll.u32 %s3017_s21, 4  ;;  %s2905_s3 = int_to_ptr.vmem [resolvable:$false] %s2904_s3 }
  0xb7   : > { %s2906_s19 = scalar_lea.vmem %s2905_s3, 256  ;;  %p2907_p13 = scmp.lt.s32.totalorder %s468_s1, %s2905_s3 }
  0xb8   : > { %p2902_p3 = pnand %p2900_p7, %p3679_p11  ;;  %p2908_p6 = scmp.lt.s32.totalorder %s2906_s19, %s2899_s15 }
  0xba   : > { %p2903_p1 = pneg %p2902_p3  ;;  %p2909_p10 = por %p2908_p6, %p2907_p13 }
  0xbc   : > { %p2910_p0 = pnand %p2909_p10, %p2903_p1 }
  0xbe   : > { %2913 = shalt.err (!%p2910_p0)
}
  0xbf   : > { %p3681_p12 = scmp.ne.s32.totalorder %s3671_s30, 0  ;;  %p3682_p8 = scmp.ne.s32.totalorder %s3662_s13, 0 }
  0xc0   : > { %s3352_s4 = sand.u32 (!%p3682_p8), 1, %s2992_s22   ;;  %p3683_p11 = scmp.ne.s32.totalorder (!%p3682_p8), %s3659_s29, 0 }
  0xc1   : > { %2650 = dma.hbm_to_vmem [thread:$0]  (!%p3681_p12), %s3328_s26, 128, %s468_s1, %s3225_s28  }
  0xc2   : > { %482 = sbr.rel (%p3682_p8) target bundleno = 1418 (0x58a), region = 68  ;;  %s3355_s5 = sshll.u32 (!%p3682_p8), %s3352_s4, 3 }
  0xc3   : > { %s485_s9 = scalar_lea.sflag (!%p3682_p8), [#allocation3], %s3352_s4  ;;  %s488_s24 = scalar_lea.vmem (!%p3682_p8), [#allocation2], %s3355_s5 }
  0xc9   : > { %2967 = dma.done.wait (%p3683_p11), %s485_s9, 128  }
  0xca   : > { %2969 = vsyncadd (%p3683_p11), %s485_s9, 4294967168  ;;  %s493_s13 = sand.u32 1, %s3123_s27   ;;  %s497_s28 = scalar_lea.vmem [#allocation5], %s3355_s5 }
  0xcb   : > { %s494_s30 = scalar_lea.sflag [#allocation6], %s493_s13 }
  0xcc   : > { %2971 = dma.done.wait (%p3683_p11), %s494_s30, 256  }
  0xcd   : > { %2973 = vsyncadd (%p3683_p11), %s494_s30, 4294967040  ;;  %s506_s14 = scalar_lea.vmem [#allocation7], %s3355_s5  ;;  %p3684_p10 = scmp.eq.s32.totalorder %s3123_s27, 0 }
  0xcf   : > { %2975 = dma.done.wait (%p3684_p10), [#allocation9], 1024   ;;  %p3685_p5 = pmov %p3684_p10 }
  0xd1   : > { %2977 = vsyncadd (%p3685_p5), [#allocation9], 4294966272  ;;  %p3686_p9 = pmov %p3685_p5 }
  0xd2   : > { %p3687_p2 = pmov %p3685_p5 }
  0xd3   : > { %2979 = dma.done.wait (%p3686_p9), [#allocation12], 512  }
  0xd4   : > { %2981 = vsyncadd (%p3687_p2), [#allocation12], 4294966784  ;;  %v3018_v0 = vmov 0.0|0.0   ;;  %vm3019_vm0 = vmmov 0   ;;  %v3020_v1 = vmov 0.0   ;;  %v663_v2 = vld [vmem:[#allocation10] sm:$0xff]  ;;  %v847_v38 = vlaneseq }
  0xd5   : > { %2599 = vmatprep.subr.bf16.mxu1 %v3018_v0  ;;  %2593 = vmatprep.subr.bf16.mxu0 %v3018_v0  ;;  %v664_v3 = vld [vmem:[#allocation10 + $0x8] sm:$0xff]  ;;  %v578_v4 = vld [vmem:[#allocation8] sm:$0xff]  ;;  %v665_v7 = vld [vmem:[#allocation10 + $0x10] sm:$0xff]  ;;  %vm589_vm1 = vcmask 261120   ;;  %s3688_s12 = sld [smem:[#allocation30_spill]]  ;;  %s3021_s1 = smov 104  }
  0xd6   : > { %2519 = vmatprep.mubr.msk.f32.mxu1 %vm3019_vm0, %v3020_v1  ;;  %2508 = vmatprep.mubr.msk.f32.mxu0 %vm3019_vm0, %v3020_v1  ;;  %v2600_v5 = vpack.c.bf16 %v664_v3, %v663_v2  ;;  %v579_v6 = vld [vmem:[#allocation8 + $0x8] sm:$0xff]  ;;  %v666_v8 = vld [vmem:[#allocation10 + $0x18] sm:$0xff]  ;;  %v580_v10 = vld [vmem:[#allocation8 + $0x10] sm:$0xff]  ;;  %s3022_s25 = smov 120   ;;  %s3023_s20 = smov 112   ;;  %v848_v42 = vshrl.u32 %v847_v38, 7 }
  0xd7   : > { %v2594_v9 = vpack.c.bf16 %v579_v6, %v578_v4  ;;  %v581_v11 = vld [vmem:[#allocation8 + $0x18] sm:$0xff]  ;;  %v2603_v12 = vpack.c.bf16 %v666_v8, %v665_v7  ;;  %v576_v14 = vld [vmem:[%s497_s28] sm:$0xff]  ;;  %v749_v18 = vld [vmem:[#allocation11 + $0x10] sm:$0xff]  ;;  %s3689_s10 = sld [smem:[#allocation31_spill]]  ;;  %v3024_v36 = vmov 1983009808  }
  0xd8   : > { %2601 = vmatpush3.bf16.msra.mxu1 %v2600_v5  ;;  %v2597_v13 = vpack.c.bf16 %v581_v11, %v580_v10  ;;  %v575_v15 = vld [vmem:[%s488_s24] sm:$0xff]  ;;  %v747_v16 = vld [vmem:[#allocation11] sm:$0xff]  ;;  %v748_v17 = vld [vmem:[#allocation11 + $0x8] sm:$0xff]  ;;  %v845_v37 = vunpack.c.l.s4 %v3024_v36  ;;  %v3025_v39 = vmov 1934713408   ;;  %vm1277_vm2 = vcmask 64512  }
  0xd9   : > { %2595 = vmatpush3.bf16.msra.mxu0 %v2594_v9  ;;  %2602 = vmatprep.subr.bf16.mxu1 %v3018_v0  ;;  %v2606_v19 = vpack.c.bf16 %v748_v17, %v747_v16  ;;  %v750_v20 = vld [vmem:[#allocation11 + $0x18] sm:$0xff]  ;;  %v2429_v23 = vld [vmem:[%s3613_s7] ss:$0 sm:$0xff]  ;;  %v877_v40 = vunpack.c.l.s4 %v3025_v39  ;;  %s3690_s17 = sld [smem:[#allocation20_spill]]  ;;  %s3691_s19 = sld [smem:[#allocation28_spill]] }
  0xda   : > { %2596 = vmatprep.subr.bf16.mxu0 %v3018_v0  ;;  %v2609_v21 = vpack.c.bf16 %v750_v20, %v749_v18  ;;  %v577_v22 = vld [vmem:[%s506_s14] sm:$0xff]  ;;  %v846_v41 = vunpack.c.0.s8 %v845_v37  ;;  %s3692_s30 = sld [smem:[#allocation32_spill]]  ;;  %s571_s18 = scalar_lea.vmem [#allocation13], %s3355_s5 }
  0xdb   : > { %v2427_v24 = vld [vmem:[%s3688_s12] ss:$0 sm:$0xff]  ;;  %v878_v45 = vunpack.c.0.s8 %v877_v40  ;;  %s3693_s12 = sld [smem:[#allocation25_spill]]  ;;  %s3026_s5 = smov [#allocation13]  }
  0xdc   : > { %2604 = vmatpush3.bf16.msra.mxu1 %v2603_v12  ;;  %v3415_v46 = vsub.s32 %v846_v41, %v848_v42  ;;  %s3695_s3 = sld [smem:[#allocation34_spill]] }
  0xdd   : > { %2598 = vmatpush3.bf16.msra.mxu0 %v2597_v13  ;;  %2533 = vmatprep.subr.mxu1 %v3020_v1  ;;  %v2431_v32 = vld [vmem:[%s3689_s10] ss:$0 sm:$0xff]  ;;  %v3417_v53 = vsub.s32 %v878_v45, %v848_v42  ;;  %s2245_s10 = sshll.u32 %s571_s18, 4  ;;  %s3558_s10 = int_to_ptr.vmem [resolvable:$true] %s2245_s10 }
  0xde   : > { %2605 = vmatprep.subr.bf16.mxu0 %v3018_v0  ;;  %s2914_s24 = scalar_lea.vmem %s3558_s10, 128 }
  0xdf   : > { %2520 = vmatmul.mubr.msk.f32.vlgmr.msra.gmra.mrb[0].mxu1 %vm589_vm1, %v576_v14  ;;  %p572_p4 = scmp.lt.s32.totalorder %s3690_s17, 1  ;;  %s2458_s11 = sshll.u32 %s3690_s17, 7 }
  0xe0   : > { %2509 = vmatmul.mubr.msk.f32.vlgmr.msra.gmra.mrb[0].mxu0 %vm589_vm1, %v575_v15  ;;  %2535 = vmatprep.mubr.msk.f32.mxu1 %vm3019_vm0, %v3020_v1  ;;  %p2915_p7 = scmp.ne.s32.totalorder %s3558_s10, %s2914_s24 }
  0xe1   : > { %2530 = vmatprep.mubr.msk.f32.mxu0 %vm3019_vm0, %v3020_v1  ;;  %2607 = vmatpush3.bf16.msra.mxu0 %v2606_v19  ;;  %s573_s15 = scalar_select %p572_p4, %s3690_s17, 1 }
  0xe2   : > { %2608 = vmatprep.subr.bf16.mxu0 %v3018_v0  ;;  %p3696_p3 = scmp.ne.s32.totalorder %s3693_s12, 0  ;;  %s2918_s17 = sshll.u32 %s3026_s5, 4  ;;  %s2919_s17 = int_to_ptr.vmem [resolvable:$false] %s2918_s17 }
  0xe3   : > { %s574_s9 = scalar_lea.vmem %s3691_s19, %s573_s15  ;;  %s3556_s19 = scalar_lea.hbm %s3695_s3, %s2458_s11 }
  0xe4   : > { %p2916_p1 = pnand %p2915_p7, %p3696_p3  ;;  %s2920_s13 = scalar_lea.vmem %s2919_s17, 256 }
  0xe5   : > { %2610 = vmatpush3.bf16.msra.mxu0 %v2609_v21  ;;  %p2921_p6 = scmp.lt.s32.totalorder %s3558_s10, %s2919_s17  ;;  %p2922_p0 = scmp.lt.s32.totalorder %s2920_s13, %s2914_s24 }
  0xe6   : > { %2543 = vmatprep.subr.mxu0 %v3020_v1  ;;  %p2917_p13 = pneg %p2916_p1 }
  0xe7   : > { %p2923_p12 = por %p2922_p0, %p2921_p6 }
  0xe8   : > { %2531 = vmatmul.mubr.msk.f32.vlgmr.msra.gmra.mrb[2].mxu0 %vm589_vm1, %v577_v22 }
  0xe9   : > { %2545 = vmatprep.mubr.msk.f32.mxu0 %vm3019_vm0, %v3020_v1  ;;  %p2924_p8 = pnand %p2923_p12, %p2917_p13 }
 0x1b2   : > { %v743_v25 = vpop.f32.mrb[0].mxu1 }
 0x1b3   : > { %v744_v26 = vadd.f32 %v2429_v23, %v743_v25  ;;  %v659_v27 = vpop.f32.mrb[0].mxu0  ;;  %v2521_v28 = vpop.f32.mrb[1].mxu1 }
 0x1b4   : > { %v660_v29 = vadd.f32 %v2427_v24, %v659_v27  ;;  %v2510_v30 = vpop.f32.mrb[1].mxu0 }
 0x1b5   : > { %985 = vrot.lane.b32.xlu1 %v744_v26, %s3021_s1  ;;  %979 = vrot.lane.b32.xlu0 %v744_v26, %s3022_s25 }
 0x1b6   : > { %v831_v31 = vmul.f32 0.35355338, %v660_v29 }
 0x1b9   : > { %982 = vrot.lane.b32.xlu0 %v744_v26, %s3023_s20  ;;  %833 = vrot.lane.b32.xlu1 %v831_v31, %s3022_s25 }
 0x1bb   : > { %v827_v33 = vpop.f32.mrb[2].mxu0 }
 0x1bc   : > { %v3412_v34 = vadd.f32 %v2431_v32, %v827_v33  ;;  %v2532_v35 = vpop.f32.mrb[3].mxu0 }
 0x1bd   : > { %836 = vrot.lane.b32.xlu0 %v831_v31, %s3023_s20  ;;  %839 = vrot.lane.b32.xlu1 %v831_v31, %s3021_s1 }
 0x1c1   : > { %1125 = vrot.lane.b32.xlu1 %v3412_v34, %s3022_s25 }
 0x227   : > { %v986_v43 = vpop.permute.xlu1 %985  ;;  %v980_v44 = vpop.permute.xlu0 %979 }
 0x228   : > { %v1004_v47 = vcombine.low %v980_v44, %v986_v43  ;;  %v1005_v48 = vcombine.high %v980_v44, %v986_v43 }
 0x22a   : > { %v1012_v54 = vrot.slane %v1004_v47, %v3415_v46  ;;  %v1019_v55 = vrot.slane %v1005_v48, %v3415_v46 }
 0x22b   : > { %v983_v49 = vpop.permute.xlu0 %982  ;;  %v834_v50 = vpop.permute.xlu1 %833 }
 0x22c   : > { %v988_v51 = vcombine.low %v744_v26, %v983_v49  ;;  %v989_v52 = vcombine.high %v744_v26, %v983_v49 }
 0x22e   : > { %v996_v56 = vrot.slane %v988_v51, %v3415_v46  ;;  %v1003_v57 = vrot.slane %v989_v52, %v3415_v46 }
 0x22f   : > { %v837_v58 = vpop.permute.xlu0 %836  ;;  %v840_v59 = vpop.permute.xlu1 %839 }
 0x230   : > { %v1020_v60 = vcombine.low %v996_v56, %v1012_v54  ;;  %v1021_v61 = vcombine.high %v996_v56, %v1012_v54  ;;  %v1036_v62 = vcombine.low %v1003_v57, %v1019_v55  ;;  %v1037_v63 = vcombine.high %v1003_v57, %v1019_v55 }
 0x231   : > { %v842_v0 = vcombine.low %v831_v31, %v837_v58  ;;  %v843_v2 = vcombine.high %v831_v31, %v837_v58  ;;  %v858_v3 = vcombine.low %v834_v50, %v840_v59  ;;  %v859_v4 = vcombine.high %v834_v50, %v840_v59 }
 0x232   : > { %v1028_v5 = vrot.slane %v1020_v60, %v3417_v53  ;;  %v1035_v6 = vrot.slane %v1021_v61, %v3417_v53  ;;  %v1044_v7 = vrot.slane %v1036_v62, %v3417_v53  ;;  %v1051_v8 = vrot.slane %v1037_v63, %v3417_v53 }
 0x233   : > { %v850_v9 = vrot.slane %v842_v0, %v3415_v46  ;;  %v857_v10 = vrot.slane %v843_v2, %v3415_v46  ;;  %v866_v11 = vrot.slane %v858_v3, %v3415_v46  ;;  %v873_v12 = vrot.slane %v859_v4, %v3415_v46  ;;  %v2439_v0 = vld [vmem:[%s574_s9] ss:$0 sm:$0xff]  ;;  %s2231_s9 = scalar_lea.sflag [#allocation4], %s3352_s4 }
 0x234   : > { %v1056_v13 = vcombine.low %v1028_v5, %v1035_v6  ;;  %v2435_v14 = vcombine.high %v1028_v5, %v1035_v6  ;;  %v1072_v15 = vcombine.low %v1044_v7, %v1051_v8  ;;  %v2436_v16 = vcombine.high %v1044_v7, %v1051_v8 }
 0x235   : > { %v874_v17 = vcombine.low %v850_v9, %v866_v11  ;;  %v875_v18 = vcombine.high %v850_v9, %v866_v11  ;;  %v890_v19 = vcombine.low %v857_v10, %v873_v12  ;;  %v891_v20 = vcombine.high %v857_v10, %v873_v12 }
 0x236   : > { %v1063_v21 = vrot.slane %v1056_v13, %v3415_v46  ;;  %v1071_v22 = vrot.slane %v2435_v14, %v3415_v46  ;;  %v1079_v23 = vrot.slane %v1072_v15, %v3415_v46  ;;  %v1087_v24 = vrot.slane %v2436_v16, %v3415_v46 }
 0x237   : > { %v882_v25 = vrot.slane %v874_v17, %v3417_v53  ;;  %v889_v26 = vrot.slane %v875_v18, %v3417_v53  ;;  %v898_v27 = vrot.slane %v890_v19, %v3417_v53  ;;  %v905_v28 = vrot.slane %v891_v20, %v3417_v53  ;;  %v1126_v18 = vpop.permute.xlu1 %1125 }
 0x238   : > { %v1088_v29 = vcombine.low %v1063_v21, %v1071_v22  ;;  %v1089_v30 = vcombine.high %v1063_v21, %v1071_v22  ;;  %v1104_v31 = vcombine.low %v1079_v23, %v1087_v24  ;;  %v1105_v32 = vcombine.high %v1079_v23, %v1087_v24 }
 0x239   : > { %v910_v33 = vcombine.low %v882_v25, %v889_v26  ;;  %v2433_v35 = vcombine.high %v882_v25, %v889_v26  ;;  %v926_v36 = vcombine.low %v898_v27, %v905_v28  ;;  %v2434_v37 = vcombine.high %v898_v27, %v905_v28 }
 0x23a   : > { %v1096_v38 = vrot.slane %v1088_v29, %v3417_v53  ;;  %v1112_v39 = vrot.slane %v1104_v31, %v3417_v53  ;;  %v1103_v40 = vrot.slane %v1089_v30, %v3417_v53  ;;  %v1119_v41 = vrot.slane %v1105_v32, %v3417_v53 }
 0x23b   : > { %v917_v42 = vrot.slane %v910_v33, %v3415_v46  ;;  %v925_v43 = vrot.slane %v2433_v35, %v3415_v46  ;;  %v933_v44 = vrot.slane %v926_v36, %v3415_v46  ;;  %v941_v45 = vrot.slane %v2434_v37, %v3415_v46 }
 0x23c   : > { %v1120_v47 = vcombine.low %v1096_v38, %v1112_v39  ;;  %v1122_v48 = vcombine.low %v1103_v40, %v1119_v41  ;;  %v1121_v60 = vcombine.high %v1096_v38, %v1112_v39  ;;  %v1123_v62 = vcombine.high %v1103_v40, %v1119_v41 }
 0x23d   : > { %v942_v49 = vcombine.low %v917_v42, %v925_v43  ;;  %v943_v50 = vcombine.high %v917_v42, %v925_v43  ;;  %v958_v51 = vcombine.low %v933_v44, %v941_v45  ;;  %v959_v52 = vcombine.high %v933_v44, %v941_v45 }
 0x23e   : > { %2534 = vmatpush3.xpose.msk.msra.mxu1 %vm1277_vm2, %v1120_v47  ;;  %2544 = vmatpush3.xpose.msk.msra.mxu0 %vm1277_vm2, %v1122_v48 }
 0x23f   : > { %2538 = vmatprep.subr.mxu1 %v3020_v1  ;;  %v950_v54 = vrot.slane %v942_v49, %v3417_v53  ;;  %v966_v55 = vrot.slane %v958_v51, %v3417_v53  ;;  %v957_v56 = vrot.slane %v943_v50, %v3417_v53  ;;  %v973_v57 = vrot.slane %v959_v52, %v3417_v53 }
 0x240   : > { %2553 = vmatprep.subr.mxu0 %v3020_v1 }
 0x241   : > { %v974_v58 = vcombine.low %v950_v54, %v966_v55  ;;  %v976_v59 = vcombine.low %v957_v56, %v973_v57  ;;  %v975_v61 = vcombine.high %v950_v54, %v966_v55  ;;  %v977_v63 = vcombine.high %v957_v56, %v973_v57 }
 0x243   : > { %2536 = vmatmul.mubr.msk.f32.vlgmr.msra.gmra.mrb[2].mxu1 %vm1277_vm2, %v974_v58  ;;  %2546 = vmatmul.mubr.msk.f32.vlgmr.msra.gmra.mrb[4].mxu0 %vm1277_vm2, %v976_v59 }
 0x244   : > { %2539 = vmatpush3.xpose.msk.msra.mxu1 %vm1277_vm2, %v1121_v60  ;;  %2540 = vmatprep.mubr.msk.f32.mxu1 %vm3019_vm0, %v3020_v1 }
 0x245   : > { %2548 = vmatprep.subr.mxu1 %v3020_v1  ;;  %2555 = vmatprep.mubr.msk.f32.mxu0 %vm3019_vm0, %v3020_v1 }
 0x247   : > { %2541 = vmatmul.mubr.msk.f32.vlgmr.msra.gmra.mrb[4].mxu1 %vm1277_vm2, %v975_v61 }
 0x248   : > { %2549 = vmatpush3.xpose.msk.msra.mxu1 %vm1277_vm2, %v1123_v62  ;;  %2550 = vmatprep.mubr.msk.f32.mxu1 %vm3019_vm0, %v3020_v1 }
 0x249   : > { %2558 = vmatprep.subr.mxu1 %v3020_v1 }
 0x24b   : > { %2551 = vmatmul.mubr.msk.f32.vlgmr.msra.gmra.mrb[6].mxu1 %vm1277_vm2, %v977_v63 }
 0x24c   : > { %2560 = vmatprep.mubr.msk.f32.mxu1 %vm3019_vm0, %v3020_v1 }
 0x316   : > { %v1350_v2 = vpop.f32.mrb[2].mxu1  ;;  %v1502_v3 = vpop.f32.mrb[4].mxu0 }
 0x317   : > { %v1351_v4 = vadd.f32 %v2439_v0, %v1350_v2  ;;  %v2537_v5 = vpop.f32.mrb[3].mxu1  ;;  %v2547_v6 = vpop.f32.mrb[5].mxu0  ;;  %v1503_v7 = vadd.f32 %v2439_v0, %v1502_v3 }
 0x319   : > { %v1582_v8 = vsel %vm1277_vm2, %v1351_v4, -inf  ;;  %v1588_v13 = vsel %vm1277_vm2, %v1503_v7, -inf }
 0x31a   : > { %1583 = vmax.xlane.f32.xlu0 %v1582_v8  ;;  %v1426_v9 = vpop.f32.mrb[4].mxu1 }
 0x31b   : > { %v1427_v10 = vadd.f32 %v2439_v0, %v1426_v9  ;;  %v2542_v11 = vpop.f32.mrb[5].mxu1 }
 0x31d   : > { %v1585_v12 = vsel %vm1277_vm2, %v1427_v10, -inf }
 0x31e   : > { %v1578_v14 = vpop.f32.mrb[6].mxu1  ;;  %1586 = vmax.xlane.f32.xlu1 %v1585_v12  ;;  %1589 = vmax.xlane.f32.xlu0 %v1588_v13 }
 0x31f   : > { %v1579_v15 = vadd.f32 %v2439_v0, %v1578_v14  ;;  %v2552_v16 = vpop.f32.mrb[7].mxu1 }
 0x321   : > { %v1591_v17 = vsel %vm1277_vm2, %v1579_v15, -inf }
 0x322   : > { %1592 = vmax.xlane.f32.xlu0 %v1591_v17 }
 0x32f   : > { %1131 = vrot.lane.b32.xlu1 %v3412_v34, %s3021_s1 }
 0x338   : > { %1128 = vrot.lane.b32.xlu0 %v3412_v34, %s3023_s20  ;;  %s3694_s20 = sld [smem:[#allocation33_spill]] }
 0x3a7   : > { %v1584_v19 = vpop.xlane.xlu0 %1583 }
 0x3a8   : > { %v1594_v20 = vsub.f32 %v1351_v4, %v1584_v19 }
 0x3aa   : > { %v1598_v21 = vmul.f32 1.442695, %v1594_v20 }
 0x3ab   : > { %v1587_v22 = vpop.xlane.xlu1 %1586  ;;  %v1590_v23 = vpop.xlane.xlu0 %1589 }
 0x3ac   : > { %2724 = vpow2.f32 %v1598_v21  ;;  %v1595_v24 = vsub.f32 %v1427_v10, %v1587_v22  ;;  %v1596_v25 = vsub.f32 %v1503_v7, %v1590_v23 }
 0x3ae   : > { %v1600_v26 = vmul.f32 1.442695, %v1595_v24  ;;  %v1602_v27 = vmul.f32 1.442695, %v1596_v25 }
 0x3af   : > { %v1132_v28 = vpop.permute.xlu1 %1131  ;;  %v1593_v29 = vpop.xlane.xlu0 %1592 }
 0x3b0   : > { %2726 = vpow2.f32 %v1600_v26  ;;  %v1597_v30 = vsub.f32 %v1579_v15, %v1593_v29  ;;  %v1150_v31 = vcombine.low %v1126_v18, %v1132_v28  ;;  %v1151_v32 = vcombine.high %v1126_v18, %v1132_v28  ;;  %v1919_v15 = vld [vmem:[%s3692_s30 + $0x8] sm:$0xff]  ;;  %v1920_v28 = vld [vmem:[%s3692_s30 + $0x10] sm:$0xff]  ;;  %v1921_v29 = vld [vmem:[%s3692_s30 + $0x18] sm:$0xff] }
 0x3b1   : > { %2728 = vpow2.f32 %v1602_v27 }
 0x3b2   : > { %v1604_v33 = vmul.f32 1.442695, %v1597_v30  ;;  %v1158_v39 = vrot.slane %v1150_v31, %v3415_v46  ;;  %v1165_v40 = vrot.slane %v1151_v32, %v3415_v46 }
 0x3b3   : > { %v1129_v35 = vpop.permute.xlu0 %1128 }
 0x3b4   : > { %2730 = vpow2.f32 %v1604_v33  ;;  %v1134_v36 = vcombine.low %v3412_v34, %v1129_v35  ;;  %v1135_v37 = vcombine.high %v3412_v34, %v1129_v35 }
 0x3b6   : > { %v2725_v38 = vpop.eup %2724  ;;  %v1142_v41 = vrot.slane %v1134_v36, %v3415_v46  ;;  %v1149_v42 = vrot.slane %v1135_v37, %v3415_v46 }
 0x3b7   : > { %v1606_v43 = vsel %vm1277_vm2, %v2725_v38, 0.0 }
 0x3b8   : > { %v1166_v44 = vcombine.low %v1142_v41, %v1158_v39  ;;  %v1167_v45 = vcombine.high %v1142_v41, %v1158_v39  ;;  %v1182_v47 = vcombine.low %v1149_v42, %v1165_v40  ;;  %v1183_v48 = vcombine.high %v1149_v42, %v1165_v40  ;;  %1607 = vadd.xlane.f32.xlu1 %v1606_v43 }
 0x3ba   : > { %v2727_v49 = vpop.eup %2726  ;;  %v1174_v50 = vrot.slane %v1166_v44, %v3417_v53  ;;  %v1181_v34 = vrot.slane %v1167_v45, %v3417_v53  ;;  %v1190_v51 = vrot.slane %v1182_v47, %v3417_v53  ;;  %v1197_v52 = vrot.slane %v1183_v48, %v3417_v53 }
 0x3bb   : > { %v1609_v54 = vsel %vm1277_vm2, %v2727_v49, 0.0  ;;  %v2729_v55 = vpop.eup %2728 }
 0x3bc   : > { %v1202_v56 = vcombine.low %v1174_v50, %v1181_v34  ;;  %v2437_v57 = vcombine.high %v1174_v50, %v1181_v34  ;;  %v1218_v58 = vcombine.low %v1190_v51, %v1197_v52  ;;  %v2438_v59 = vcombine.high %v1190_v51, %v1197_v52  ;;  %1610 = vadd.xlane.f32.xlu0 %v1609_v54  ;;  %v2456_v52 = vld [vmem:[%s3694_s20] ss:$0 sm:$0xff] }
 0x3bd   : > { %v1612_v2 = vsel %vm1277_vm2, %v2729_v55, 0.0 }
 0x3be   : > { %v2731_v60 = vpop.eup %2730  ;;  %v1209_v61 = vrot.slane %v1202_v56, %v3415_v46  ;;  %v1217_v62 = vrot.slane %v2437_v57, %v3415_v46  ;;  %v1225_v63 = vrot.slane %v1218_v58, %v3415_v46  ;;  %v1233_v0 = vrot.slane %v2438_v59, %v3415_v46 }
 0x3bf   : > { %v1615_v3 = vsel %vm1277_vm2, %v2731_v60, 0.0 }
 0x3c0   : > { %1613 = vadd.xlane.f32.xlu0 %v1612_v2  ;;  %1616 = vadd.xlane.f32.xlu1 %v1615_v3  ;;  %v1234_v4 = vcombine.low %v1209_v61, %v1217_v62  ;;  %v1250_v5 = vcombine.low %v1225_v63, %v1233_v0  ;;  %v1235_v6 = vcombine.high %v1209_v61, %v1217_v62 }
 0x3c1   : > { %v1251_v7 = vcombine.high %v1225_v63, %v1233_v0 }
 0x3c2   : > { %v1242_v8 = vrot.slane %v1234_v4, %v3417_v53  ;;  %v1258_v9 = vrot.slane %v1250_v5, %v3417_v53  ;;  %v1249_v10 = vrot.slane %v1235_v6, %v3417_v53 }
 0x3c3   : > { %v1265_v11 = vrot.slane %v1251_v7, %v3417_v53  ;;  %v1918_v53 = vld [vmem:[%s3692_s30] sm:$0xff] }
 0x3c4   : > { %v1266_v12 = vcombine.low %v1242_v8, %v1258_v9  ;;  %v1267_v46 = vcombine.high %v1242_v8, %v1258_v9 }
 0x3c5   : > { %v1268_v13 = vcombine.low %v1249_v10, %v1265_v11  ;;  %v1269_v14 = vcombine.high %v1249_v10, %v1265_v11 }
 0x3c6   : > { %2554 = vmatpush3.msra.mxu0 %v1266_v12  ;;  %2559 = vmatpush3.msra.mxu1 %v1267_v46 }
 0x3c7   : > { %2556 = vmatmul.mubr.msk.f32.vlgmr.msra.gmra.mrb[6].mxu0 %vm1277_vm2, %v2725_v38  ;;  %2561 = vmatmul.mubr.msk.f32.vlgmr.msra.gmra.mrb[8].mxu1 %vm1277_vm2, %v2727_v49 }
 0x3c8   : > { %2563 = vmatprep.subr.mxu0 %v3020_v1  ;;  %2568 = vmatprep.subr.mxu1 %v3020_v1 }
 0x3c9   : > { %2564 = vmatpush3.msra.mxu0 %v1268_v13  ;;  %2569 = vmatpush3.msra.mxu1 %v1269_v14 }
 0x3ca   : > { %2565 = vmatprep.mubr.msk.f32.mxu0 %vm3019_vm0, %v3020_v1  ;;  %2570 = vmatprep.mubr.msk.f32.mxu1 %vm3019_vm0, %v3020_v1 }
 0x3cb   : > { %2566 = vmatmul.mubr.msk.f32.vlgmr.msra.gmra.mrb[8].mxu0 %vm1277_vm2, %v2729_v55  ;;  %2571 = vmatmul.mubr.msk.f32.vlgmr.msra.gmra.mrb[10].mxu1 %vm1277_vm2, %v2731_v60 }
 0x3cc   : > { %2573 = vmatprep.subr.mxu0 %v3020_v1  ;;  %2578 = vmatprep.subr.mxu1 %v3020_v1 }
 0x3cd   : > { %2575 = vmatprep.mubr.msk.f32.mxu0 %vm3019_vm0, %v3020_v1  ;;  %2580 = vmatprep.mubr.msk.f32.mxu1 %vm3019_vm0, %v3020_v1 }
 0x3ce   : > { %2574 = vmatpush3.msra.mxu0 %v1918_v53  ;;  %2579 = vmatpush3.msra.mxu1 %v1919_v15 }
 0x3cf   : > { %2583 = vmatprep.subr.mxu0 %v3020_v1  ;;  %2588 = vmatprep.subr.mxu1 %v3020_v1 }
 0x445   : > { %v1608_v17 = vpop.xlane.xlu1 %1607 }
 0x446   : > { %2732 = vrcp.f32 %v1608_v17 }
 0x449   : > { %v1611_v16 = vpop.xlane.xlu0 %1610 }
 0x44a   : > { %2734 = vrcp.f32 %v1611_v16 }
 0x44d   : > { %v1617_v18 = vpop.xlane.xlu1 %1616  ;;  %v1614_v19 = vpop.xlane.xlu0 %1613 }
 0x44e   : > { %2736 = vrcp.f32 %v1617_v18 }
 0x44f   : > { %2738 = vrcp.f32 %v1614_v19 }
 0x450   : > { %v2733_v20 = vpop.eup %2732 }
 0x454   : > { %v2735_v21 = vpop.eup %2734 }
 0x458   : > { %v2737_v30 = vpop.eup %2736 }
 0x459   : > { %v2739_v31 = vpop.eup %2738 }
 0x49a   : > { %v1687_v22 = vpop.f32.mrb[6].mxu0  ;;  %v1760_v23 = vpop.f32.mrb[8].mxu1 }
 0x49b   : > { %v1914_v24 = vmul.f32 %v2733_v20, %v1687_v22  ;;  %v1915_v25 = vmul.f32 %v2735_v21, %v1760_v23  ;;  %v2557_v26 = vpop.f32.mrb[7].mxu0  ;;  %v2562_v27 = vpop.f32.mrb[9].mxu1 }
 0x49d   : > { %2576 = vmatmul.mubr.msk.f32.vlgmr.msra.gmra.mrb[10].mxu0 %vm1277_vm2, %v1914_v24  ;;  %2581 = vmatmul.mubr.msk.f32.vlgmr.msra.gmra.mrb[12].mxu1 %vm1277_vm2, %v1915_v25 }
 0x49e   : > { %v1833_v32 = vpop.f32.mrb[8].mxu0  ;;  %v1906_v33 = vpop.f32.mrb[10].mxu1  ;;  %2584 = vmatpush3.msra.mxu0 %v1920_v28  ;;  %2585 = vmatprep.mubr.msk.f32.mxu0 %vm3019_vm0, %v3020_v1 }
 0x49f   : > { %v1916_v35 = vmul.f32 %v2739_v31, %v1833_v32  ;;  %v1917_v36 = vmul.f32 %v2737_v30, %v1906_v33  ;;  %v2567_v37 = vpop.f32.mrb[9].mxu0  ;;  %v2572_v38 = vpop.f32.mrb[11].mxu1  ;;  %2589 = vmatpush3.msra.mxu1 %v1921_v29  ;;  %2590 = vmatprep.mubr.msk.f32.mxu1 %vm3019_vm0, %v3020_v1 }
 0x4a1   : > { %2586 = vmatmul.mubr.msk.f32.vlgmr.msra.gmra.mrb[12].mxu0 %vm1277_vm2, %v1916_v35  ;;  %2591 = vmatmul.mubr.msk.f32.vlgmr.msra.gmra.mrb[14].mxu1 %vm1277_vm2, %v1917_v36 }
 0x570   : > { %v1991_v39 = vpop.f32.mrb[10].mxu0  ;;  %v2064_v40 = vpop.f32.mrb[12].mxu1 }
 0x571   : > { %v2214_v41 = vsel %vm589_vm1, %v1991_v39, 0.0  ;;  %v2215_v42 = vsel %vm589_vm1, %v2064_v40, 0.0  ;;  %v2577_v43 = vpop.f32.mrb[11].mxu0  ;;  %v2582_v44 = vpop.f32.mrb[13].mxu1 }
 0x572   : > { %v2216_v45 = vadd.f32 %v2215_v42, %v2214_v41 }
 0x574   : > { %v2137_v47 = vpop.f32.mrb[12].mxu0  ;;  %v2210_v48 = vpop.f32.mrb[14].mxu1 }
 0x575   : > { %v2217_v1 = vsel %vm589_vm1, %v2137_v47, 0.0  ;;  %v2587_v49 = vpop.f32.mrb[13].mxu0  ;;  %v2592_v50 = vpop.f32.mrb[15].mxu1  ;;  %v2219_v51 = vsel %vm589_vm1, %v2210_v48, 0.0 }
 0x576   : > { %v2218_v34 = vadd.f32 %v2217_v1, %v2216_v45 }
 0x578   : > { %v2220_v54 = vadd.f32 %v2219_v51, %v2218_v34 }
 0x57a   : > { %v2228_v55 = vadd.f32 %v2456_v52, %v2220_v54 }
 0x57c   : > { %2229 = vst.msk [vmem:[%s571_s18] sm:$0xff] %vm589_vm1, %v2228_v55 }
 0x57d   : > { %2927 = shalt.err (!%p2924_p8)
}
 0x57e   : > { %s2928_s4 = scalar_lea.hbm %s3556_s19, 128  ;;  %s2932_s27 = scalar_lea.hbm %s3695_s3, 256 }
 0x57f   : > { %p2929_p11 = scmp.ne.s32.totalorder %s3556_s19, %s2928_s4  ;;  %p2933_p9 = scmp.lt.u32.totalorder %s3556_s19, %s3695_s3 }
 0x580   : > { %p2934_p2 = scmp.lt.u32.totalorder %s2932_s27, %s2928_s4  ;;  %p2936_p7 = scmp.lt.u32.totalorder %s2928_s4, %s3556_s19 }
 0x581   : > { %p2930_p10 = pnand %p2929_p11, %p3696_p3 }
 0x582   : > { %p2935_p4 = por %p2934_p2, %p2933_p9 }
 0x583   : > { %p2931_p5 = pneg %p2930_p10 }
 0x584   : > { %p2937_p1 = por %p2936_p7, %p2935_p4 }
 0x586   : > { %p2938_p13 = pnand %p2937_p1, %p2931_p5 }
 0x588   : > { %2941 = shalt.err (!%p2938_p13)
}
 0x589   : > { %2629 = dma.vmem_to_hbm [thread:$0]  (%p3696_p3), %s3558_s10, 128, %s3556_s19, %s2231_s9  }
 0x58a PF: > { %s3697_s26 = sld [smem:[#allocation19_spill]]  ;;  %s3698_s1 = sld [smem:[#allocation23_spill]] }
 0x58b   : > { %s3699_s25 = sld [smem:[#allocation22_spill]] }
 0x590   : > { %s2257_s20 = sand.u32 1, %s3697_s26   ;;  %p3700_p6 = scmp.ne.s32.totalorder %s3698_s1, 0 }
 0x591   : > { %p3701_p0 = scmp.ge.s32.totalorder %s3699_s25, 2  ;;  %s2258_s11 = scalar_lea.sflag [#allocation4], %s2257_s20 }
 0x593   : > { %p2652_p12 = pnand %p3701_p0, %p3700_p6 }
 0x595   : > { %2983 = dma.done.wait (!%p2652_p12), %s2258_s11, 128  }
 0x596   : > { %2985 = vsyncadd (!%p2652_p12), %s2258_s11, 4294967168  ;;  %s33_s26 = sadd.s32 1, %s3699_s25   ;;  %s3702_s12 = sld [smem:[#allocation26_spill]] }
 0x597   : > { %p30_p8 = scmp.ge.s32.totalorder %s33_s26, 4   ;;  %s3703_s24 = sld [smem:[#allocation21_spill]] }
 0x598   : > { %s3704_s25 = sld [smem:[#allocation24_spill]]  ;;  %s3705_s21 = smov %s2992_s22 }
 0x599   : > { %s3706_s22 = smov %s2996_s23  ;;  %32 = sbr.rel (!%p30_p8) target bundleno = 19 (0x13), region = 152 }
 0x59c   : > { %s3707_s23 = smov %s3702_s12 }
 0x5a0   :  { %2263 = vsyncpa [#allocation3], 1 }
 0x5a1   :  { %2265 = vsyncpa [#allocation3 + $0x1], 1 }
 0x5a2   :  { %2266 = vsyncpa [#allocation6], 1 }
 0x5a3   :  { %2268 = vsyncpa [#allocation6 + $0x1], 1 }
 0x5a4   :  { %2269 = vsyncpa [#allocation9], 1 }
 0x5a5   :  { %2270 = vsyncpa [#allocation12], 1 }
 0x5a6   :  { %2271 = vsyncpa [#allocation4], 1 }
 0x5a7   :  { %2273 = vsyncpa [#allocation4 + $0x1], 1 }

</bundles_post_ra>
